<compile_context>
chip_gen: v7x
topology: tpu7x:2x2x1
jax: 0.10.0
libtpu: 0.0.40
codegen_flags: <defaults>
</compile_context>

<pallas_src>
import jax
import jax.numpy as jnp
import numpy as np
from jax.experimental import pallas as pl
from jax.experimental.pallas import tpu as pltpu


# ----------------------------------------------------------------------------
# Primary path: zero-DMA aliased no-op kernel (feedback item #2).
# ----------------------------------------------------------------------------
def _identity_alias_kernel(x_ref, o_ref):
    # o_ref is aliased to x_ref (same HBM buffer, memory_space=pl.ANY), so the
    # result is already in place. pltpu.touch pins a read+write dependency on
    # the aliased output so the otherwise-empty body keeps its ordering and is
    # not optimized away.
    del x_ref
    pltpu.touch(o_ref)


def _identity_alias(x):
    return pl.pallas_call(
        _identity_alias_kernel,
        out_shape=jax.ShapeDtypeStruct(x.shape, x.dtype),
        # Raw HBM refs, no auto-DMA, no VMEM usage -> scales to any size on
        # v5e / v6e / v7x (no scoped-VMEM ceiling to hit).
        in_specs=[pl.BlockSpec(memory_space=pl.ANY)],
        out_specs=pl.BlockSpec(memory_space=pl.ANY),
        input_output_aliases={0: 0},
        compiler_params=pltpu.CompilerParams(has_side_effects=True),
    )(x)


# ----------------------------------------------------------------------------
# Fallback path: the previously-verified single-shot VMEM copy (small inputs).
# Only used if the aliased no-op path is unavailable in this environment.
# ----------------------------------------------------------------------------
def _identity_copy_kernel(x_ref, o_ref):
    o_ref[...] = x_ref[...]


def _identity_copy(x):
    orig_shape = x.shape
    # Lane-dense 2-D view with NO transpose: NCHW -> [N*C, H*W] (H*W = 256 is
    # a multiple of 128 -> unmasked, full-width stores).
    if x.ndim == 4:
        n, c, h, w = orig_shape
        x2 = x.reshape(n * c, h * w)
    elif x.ndim >= 2:
        x2 = x.reshape(-1, orig_shape[-1])
    else:
        x2 = x.reshape(1, -1)

    out2 = pl.pallas_call(
        _identity_copy_kernel,
        out_shape=jax.ShapeDtypeStruct(x2.shape, x.dtype),
        in_specs=[pl.BlockSpec(memory_space=pltpu.MemorySpace.VMEM)],
        out_specs=pl.BlockSpec(memory_space=pltpu.MemorySpace.VMEM),
    )(x2)
    return out2.reshape(orig_shape)


def identity_forward(x):
    """Identity forward pass: returns x unchanged (zero-DMA aliased kernel)."""
    try:
        out = _identity_alias(x)
        jax.block_until_ready(out)  # surface any async runtime error here
        return out
    except Exception:
        # Safety net: bit-exact copy kernel (pays one HBM read+write).
        return _identity_copy(x)


if __name__ == "__main__":
    # Small shape consistent with an encoder observation: [N, C, H, W]
    N, C, H, W = 2, 4, 16, 16

    key = jax.random.PRNGKey(0)
    x = jax.random.normal(key, (N, C, H, W), dtype=jnp.float32)

    # Host-side reference taken BEFORE the call (the output aliases the input
    # buffer, so compare against a pre-saved host copy).
    x_host = np.asarray(jax.device_get(x))

    out = identity_forward(x)
    jax.block_until_ready(out)

    out_host = np.asarray(jax.device_get(out))
    assert out_host.shape == x_host.shape
    assert out_host.dtype == x_host.dtype
    assert np.array_equal(out_host, x_host)

    print("KERNEL_OK")
</pallas_src>

<mosaic_0001>
module attributes {stable_mosaic.version = 11 : i64} {
  func.func @_identity_alias_kernel(%arg0: memref<2x4x16x16xf32, #tpu.memory_space<any>>, %arg1: memref<2x4x16x16xf32, #tpu.memory_space<any>>) attributes {dimension_semantics = [], scalar_prefetch = 0 : i64, scratch_operands = 0 : i64, tpu.core_type = #tpu.core_type<tc>} {
    return
  }
}

module attributes {stable_mosaic.version = 11 : i64} {
  func.func @_identity_copy_kernel(%arg0: memref<8x256xf32, #tpu.memory_space<vmem>>, %arg1: memref<8x256xf32, #tpu.memory_space<vmem>>) attributes {dimension_semantics = [], scalar_prefetch = 0 : i64, scratch_operands = 0 : i64, tpu.core_type = #tpu.core_type<tc>} {
    %c0 = arith.constant 0 : index
    %c0_0 = arith.constant 0 : index
    %0 = vector.load %arg0[%c0, %c0_0] : memref<8x256xf32, #tpu.memory_space<vmem>>, vector<8x256xf32>
    %c0_1 = arith.constant 0 : index
    %c0_2 = arith.constant 0 : index
    %1 = vector.load %arg1[%c0_1, %c0_2] : memref<8x256xf32, #tpu.memory_space<vmem>>, vector<8x256xf32>
    tpu.vector_store %arg1[%c0_1, %c0_2], %0 {strides = array<i32>} : memref<8x256xf32, #tpu.memory_space<vmem>>, vector<8x256xf32>,
    return
  }
}

</mosaic_0001>

<bundles_post_ra>
// kernel: tpu_custom_call.1
= control target key start
LH: loop header
LB: loop body
LE: loop exit
PB: predicated region body
PF: predicated region fallthrough
CT: control target
= control target key end

     0   :  { %s16_s0 = inlined_call_operand.hbm [shape: f32[2,4,16,16], index: 0, kind: input, shape index: {}, may-alias: {0,1}]   ;;  %s17_s1 = inlined_call_operand.hbm [shape: f32[2,4,16,16], index: 1, kind: output, shape index: {}, may-alias: {0,1}]  }

// kernel: tpu_custom_call.1
= control target key start
LH: loop header
LB: loop body
LE: loop exit
PB: predicated region body
PF: predicated region fallthrough
CT: control target
= control target key end

     0   :  { %6 = vsyncpa [#allocation3], 0  ;;  %s126_s0 = inlined_call_operand.hbm [shape: f32[8,256], index: 0, kind: input, shape index: {}]   ;;  %s127_s1 = inlined_call_operand.hbm [shape: f32[8,256], index: 1, kind: output, shape index: {}]  }
   0x1   :  { %7 = vsyncpa [#allocation4], 0  ;;  %s90_s6 = smov [#allocation2]   ;;  %s42_s10 = scalar_lea.hbm %s126_s0, 256 }
   0x2   :  { %s14_s7 = sshll.u32 %s90_s6, 4  ;;  %p43_p0 = scmp.ne.s32.totalorder %s126_s0, %s42_s10  ;;  %s15_s7 = int_to_ptr.vmem [resolvable:$true] %s14_s7 }
   0x3   :  { %p46_p1 = scmp.lt.u32.totalorder %s42_s10, %s126_s0 }
   0x5   :  { %p48_p2 = pnand %p46_p1, %p43_p0 }
   0x7   :  { %51 = shalt.err (!%p48_p2)
}
   0x8   :  { %s52_s15 = scalar_lea.vmem %s15_s7, 256  ;;  %p57_p4 = scmp.lt.s32.totalorder %s15_s7, %s15_s7 }
   0x9   :  { %p53_p3 = scmp.ne.s32.totalorder %s15_s7, %s52_s15  ;;  %p58_p5 = scmp.lt.s32.totalorder %s52_s15, %s52_s15 }
   0xb   :  { %p59_p6 = por %p58_p5, %p57_p4 }
   0xd   :  { %p60_p7 = pnand %p59_p6, %p53_p3 }
   0xf   :  { %63 = shalt.err (!%p60_p7)
}
  0x10   :  { %17 = dma.hbm_to_vmem [thread:$0]  %s126_s0, 256, %s15_s7, [#allocation3]  }
  0x11   :  { %86 = dma.done.wait [#allocation3], 256  }
  0x12   :  { %87 = vsyncadd [#allocation3], 4294967040  ;;  %s91_s18 = smov [#allocation5]   ;;  %v21_v0 = vld [vmem:[#allocation2] sm:$0xff]  ;;  %v22_v1 = vld [vmem:[#allocation2 + $0x8] sm:$0xff] }
  0x13   :  { %s31_s19 = sshll.u32 %s91_s18, 4  ;;  %23 = vst [vmem:[#allocation5] sm:$0xff] %v21_v0  ;;  %24 = vst [vmem:[#allocation5 + $0x8] sm:$0xff] %v22_v1  ;;  %s32_s19 = int_to_ptr.vmem [resolvable:$true] %s31_s19 }
  0x14   :  { %s64_s20 = scalar_lea.vmem %s32_s19, 256  ;;  %p69_p9 = scmp.lt.s32.totalorder %s32_s19, %s32_s19 }
  0x15   :  { %p65_p8 = scmp.ne.s32.totalorder %s32_s19, %s64_s20  ;;  %p70_p10 = scmp.lt.s32.totalorder %s64_s20, %s64_s20 }
  0x17   :  { %p71_p11 = por %p70_p10, %p69_p9 }
  0x19   :  { %p72_p12 = pnand %p71_p11, %p65_p8 }
  0x1b   :  { %75 = shalt.err (!%p72_p12)
}
  0x1c   :  { %s76_s0 = scalar_lea.hbm %s127_s1, 256 }
  0x1d   :  { %p77_p13 = scmp.ne.s32.totalorder %s127_s1, %s76_s0  ;;  %p80_p0 = scmp.lt.u32.totalorder %s76_s0, %s127_s1 }
  0x1f   :  { %p82_p1 = pnand %p80_p0, %p77_p13 }
  0x21   :  { %85 = shalt.err (!%p82_p1)
}
  0x22   :  { %34 = dma.vmem_to_hbm [thread:$0]  %s32_s19, 256, %s127_s1, [#allocation4]  }
  0x23   :  { %88 = dma.done.wait [#allocation4], 256  }
  0x24   :  { %89 = vsyncadd [#allocation4], 4294967040 }
  0x25   :  { %38 = vsyncpa [#allocation3], 1 }
  0x26   :  { %39 = vsyncpa [#allocation4], 1 }

</bundles_post_ra>
